<compile_context>
chip_gen: v7x
topology: tpu7x:2x2x1
jax: 0.10.0
libtpu: 0.0.40
codegen_flags: <defaults>
</compile_context>

<pallas_src>
import jax
import jax.numpy as jnp
from jax.experimental import pallas as pl
from jax.experimental.pallas import tpu as pltpu

INPUT_SIZE = 5
HIDDEN = 10
GATE_PAD = 16                 # per-gate row padding (10 real + 6 zero rows)
K_AUG = INPUT_SIZE + 1        # 5 features + constant-1 "bias" row


def _round_up(a, b):
    return (a + b - 1) // b * b


def _gru_linear_kernel(x_ref, w_ref, b_hn_ref, w_fn_ref, b_fn_ref, o_ref):
    """Zero-h0 GRU step + Linear(10->1) on a (K_AUG, TILE_N) column tile.

    All bias/scale algebra is pre-folded into the operands (see wrapper):
      g[0:16]  = 0.5*(W_ir x + b_ir + b_hr)          -> r = 0.5*tanh(.)+0.5
      g[16:32] = 0.5*(W_iz x + b_iz + b_hz)          -> z = 0.5*tanh(.)+0.5
      g[32:48] = W_in x + b_in + 0.5*b_hn
      n = tanh(g[32:48] + tanh(g[0:16]) * (0.5*b_hn))
      h = (1 - z) * n = 0.5*(1 - tanh(g[16:32])) * n
      out = w_fn . h + b_fn = (0.5*w_fn) . ((1 - t_z)*n) + b_fn
    """
    # Single bf16 MXU pass, f32 accumulation.  (48, K_AUG) @ (K_AUG, TN)
    g = jnp.dot(w_ref[...], x_ref[...],
                preferred_element_type=jnp.float32)            # (48, TN) f32

    t_r = jnp.tanh(g[0 * GATE_PAD:1 * GATE_PAD, :])
    t_z = jnp.tanh(g[1 * GATE_PAD:2 * GATE_PAD, :])
    n = jnp.tanh(g[2 * GATE_PAD:3 * GATE_PAD, :] + t_r * b_hn_ref[...])
    h = (1.0 - t_z) * n                                        # (16, TN)

    # Linear(10 -> 1): broadcast-multiply against the (zero-padded, pre-halved)
    # weight column + sublane reduce -> lane-dense (1, TN) output.
    o_ref[...] = (jnp.sum(h * w_fn_ref[...], axis=0, keepdims=True)
                  + b_fn_ref[...])


def goldrate_predictor_gru(x, params, *, max_tile_n=131072):
    """x: any shape with total elements divisible by 5 (matches x.view(-1,1,5))."""
    w_ih, w_hh, b_ih, b_hh, w_fn, b_fn = params
    f32 = jnp.float32
    w_ih = w_ih.astype(f32)
    b_ih = b_ih.astype(f32)
    b_hh = b_hh.astype(f32)
    w_fn = w_fn.astype(f32)
    b_fn = b_fn.astype(f32)

    # ---- wrapper-side weight prep (h0 == 0 and all scalings folded away) ----
    w_ir, w_iz, w_in = (w_ih[0:HIDDEN], w_ih[HIDDEN:2 * HIDDEN],
                        w_ih[2 * HIDDEN:3 * HIDDEN])
    b_r = b_ih[0:HIDDEN] + b_hh[0:HIDDEN]                  # b_ir + b_hr
    b_z = b_ih[HIDDEN:2 * HIDDEN] + b_hh[HIDDEN:2 * HIDDEN]
    b_in = b_ih[2 * HIDDEN:3 * HIDDEN]
    b_hn = b_hh[2 * HIDDEN:3 * HIDDEN]

    w_big = jnp.zeros((3 * GATE_PAD, K_AUG), f32)
    # r gate (pre-scaled by 0.5 for the tanh-based sigmoid)
    w_big = w_big.at[0:HIDDEN, 0:INPUT_SIZE].set(0.5 * w_ir)
    w_big = w_big.at[0:HIDDEN, INPUT_SIZE].set(0.5 * b_r)
    # z gate (pre-scaled by 0.5)
    w_big = w_big.at[GATE_PAD:GATE_PAD + HIDDEN, 0:INPUT_SIZE].set(0.5 * w_iz)
    w_big = w_big.at[GATE_PAD:GATE_PAD + HIDDEN, INPUT_SIZE].set(0.5 * b_z)
    # n gate (unscaled); bias picks up the +0.5*b_hn term from r's "+0.5"
    w_big = w_big.at[2 * GATE_PAD:2 * GATE_PAD + HIDDEN, 0:INPUT_SIZE].set(w_in)
    w_big = w_big.at[2 * GATE_PAD:2 * GATE_PAD + HIDDEN, INPUT_SIZE].set(
        b_in + 0.5 * b_hn)
    w_big = w_big.astype(jnp.bfloat16)                      # bf16 MXU operand

    b_hn_half = jnp.zeros((GATE_PAD, 1), f32).at[0:HIDDEN, 0].set(0.5 * b_hn)
    w_fn_half = jnp.zeros((GATE_PAD, 1), f32).at[0:HIDDEN, 0].set(0.5 * w_fn[0])
    b_fn_2d = b_fn.reshape(1, 1)

    # ---- activation prep: transpose so N lies on the 128-lane axis, append
    #      a constant-1 row that carries the biases through the matmul ----
    x2 = x.reshape(-1, INPUT_SIZE).astype(jnp.bfloat16)     # (N, 5)
    n = x2.shape[0]
    n_pad = _round_up(n, 128)                               # pad only to 128
    x2p = jnp.pad(x2, ((0, n_pad - n), (0, 0)))             # zero-padded rows
    x_t = jnp.concatenate(
        [x2p.T, jnp.ones((1, n_pad), jnp.bfloat16)], axis=0)  # (6, n_pad)

    # ---- tile selection ----
    tile_n = min(max_tile_n, n_pad)
    # If a single tile would cover the whole batch, split it so the "parallel"
    # N axis has >=2 grid steps and both v7x TensorCores get work.
    if tile_n >= n_pad and n_pad >= 256:
        tile_n = _round_up((n_pad + 1) // 2, 128)
    grid = (pl.cdiv(n_pad, tile_n),)                        # ragged last block OK

    out_t = pl.pallas_call(
        _gru_linear_kernel,
        out_shape=jax.ShapeDtypeStruct((1, n_pad), f32),
        grid=grid,
        in_specs=[
            pl.BlockSpec((K_AUG, tile_n), lambda i: (0, i)),         # x tile
            pl.BlockSpec((3 * GATE_PAD, K_AUG), lambda i: (0, 0)),   # W (+bias col)
            pl.BlockSpec((GATE_PAD, 1), lambda i: (0, 0)),           # 0.5*b_hn
            pl.BlockSpec((GATE_PAD, 1), lambda i: (0, 0)),           # 0.5*w_fn col
            pl.BlockSpec((1, 1), lambda i: (0, 0)),                  # b_fn
        ],
        out_specs=pl.BlockSpec((1, tile_n), lambda i: (0, i)),
        compiler_params=pltpu.CompilerParams(
            dimension_semantics=("parallel",),      # shard N across TCs (v7x)
            # Double-buffered footprint at tile_n=128K is ~16-20 MiB; 32 MiB is
            # within the scoped default on v5e/v6e/v7x and leaves headroom on
            # v7x's 64 MiB physical VMEM.
            vmem_limit_bytes=32 * 1024 * 1024,
        ),
    )(x_t, w_big, b_hn_half, w_fn_half, b_fn_2d)

    return out_t[0, :n].reshape(n, 1)


def init_params(key):
    """Deterministic parameters matching nn.GRU(5,10) + nn.Linear(10,1) shapes."""
    k = jax.random.split(key, 6)
    s_gru = 1.0 / jnp.sqrt(HIDDEN)
    s_fn = 1.0 / jnp.sqrt(HIDDEN)
    w_ih = jax.random.uniform(k[0], (3 * HIDDEN, INPUT_SIZE), jnp.float32, -s_gru, s_gru)
    w_hh = jax.random.uniform(k[1], (3 * HIDDEN, HIDDEN), jnp.float32, -s_gru, s_gru)
    b_ih = jax.random.uniform(k[2], (3 * HIDDEN,), jnp.float32, -s_gru, s_gru)
    b_hh = jax.random.uniform(k[3], (3 * HIDDEN,), jnp.float32, -s_gru, s_gru)
    w_fn = jax.random.uniform(k[4], (1, HIDDEN), jnp.float32, -s_fn, s_fn)
    b_fn = jax.random.uniform(k[5], (1,), jnp.float32, -s_fn, s_fn)
    return (w_ih, w_hh, b_ih, b_hh, w_fn, b_fn)


def reference_forward(x, params):
    """Pure-JAX f32 reference of the PyTorch forward (for correctness check)."""
    (w_ih, w_hh, b_ih, b_hh, w_fn, b_fn) = params
    x2 = x.reshape(-1, INPUT_SIZE).astype(jnp.float32)
    h = jnp.zeros((x2.shape[0], HIDDEN), jnp.float32)
    gi = x2 @ w_ih.T + b_ih
    gh = h @ w_hh.T + b_hh
    i_r, i_z, i_n = jnp.split(gi, 3, axis=1)
    h_r, h_z, h_n = jnp.split(gh, 3, axis=1)
    r = jax.nn.sigmoid(i_r + h_r)
    z = jax.nn.sigmoid(i_z + h_z)
    n = jnp.tanh(i_n + r * h_n)
    h_new = (1.0 - z) * n + z * h
    return h_new @ w_fn.T + b_fn


if __name__ == "__main__":
    key = jax.random.PRNGKey(0)
    k_x, k_x2, k_p = jax.random.split(key, 3)
    params = init_params(k_p)

    # bf16 MXU operands give ~1e-2-level absolute error vs the exact f32
    # reference, so the tolerance is relaxed accordingly.
    ATOL = 5e-2

    # Small input consistent with forward: (2, 4, 5) -> view(-1,1,5) -> N = 8.
    x = jax.random.normal(k_x, (2, 4, INPUT_SIZE), dtype=jnp.float32)
    out = jax.block_until_ready(goldrate_predictor_gru(x, params))
    ref = reference_forward(x, params)
    assert out.shape == (8, 1), out.shape
    assert jnp.allclose(out, ref, atol=ATOL, rtol=0.0), (
        float(jnp.max(jnp.abs(out - ref))))

    # Larger input: default tiling path (tile split for 2-TC + ragged trailing
    # block: n=600 -> n_pad=640, tile=384, grid=2, second block partial).
    x_big = jax.random.normal(k_x2, (600, INPUT_SIZE), dtype=jnp.float32)
    out_big = jax.block_until_ready(goldrate_predictor_gru(x_big, params))
    ref_big = reference_forward(x_big, params)
    assert out_big.shape == (600, 1), out_big.shape
    assert jnp.allclose(out_big, ref_big, atol=ATOL, rtol=0.0), (
        float(jnp.max(jnp.abs(out_big - ref_big))))

    # Forced small tiles: exercises a longer grid of full blocks (grid=5).
    out_small_tile = jax.block_until_ready(
        goldrate_predictor_gru(x_big, params, max_tile_n=128))
    assert jnp.allclose(out_small_tile, ref_big, atol=ATOL, rtol=0.0), (
        float(jnp.max(jnp.abs(out_small_tile - ref_big))))

    print("KERNEL_OK")
</pallas_src>

<mosaic_0001>
module attributes {stable_mosaic.version = 11 : i64} {
  func.func @_gru_linear_kernel(%arg0: i32, %arg1: memref<6x128xbf16, #tpu.memory_space<vmem>>, %arg2: memref<48x6xbf16, #tpu.memory_space<vmem>>, %arg3: memref<16x1xf32, #tpu.memory_space<vmem>>, %arg4: memref<16x1xf32, #tpu.memory_space<vmem>>, %arg5: memref<1x1xf32, #tpu.memory_space<vmem>>, %arg6: memref<1x128xf32, #tpu.memory_space<vmem>>) attributes {dimension_semantics = [#tpu.dimension_semantics<parallel>], iteration_bounds = array<i64: 1>, scalar_prefetch = 0 : i64, scratch_operands = 0 : i64, tpu.core_type = #tpu.core_type<tc>, window_params = [{transform_indices = @transform_0, window_bounds = array<i64: 6, 128>}, {pipeline_mode = #tpu.pipeline_mode<synchronous>, transform_indices = @transform_1, window_bounds = array<i64: 48, 6>}, {pipeline_mode = #tpu.pipeline_mode<synchronous>, transform_indices = @transform_2, window_bounds = array<i64: 16, 1>}, {pipeline_mode = #tpu.pipeline_mode<synchronous>, transform_indices = @transform_3, window_bounds = array<i64: 16, 1>}, {pipeline_mode = #tpu.pipeline_mode<synchronous>, transform_indices = @transform_4, window_bounds = array<i64: 1, 1>}, {transform_indices = @transform_5, window_bounds = array<i64: 1, 128>}]} {
    %c0 = arith.constant 0 : index
    %c0_0 = arith.constant 0 : index
    %0 = vector.load %arg2[%c0, %c0_0] : memref<48x6xbf16, #tpu.memory_space<vmem>>, vector<48x6xbf16>
    %c0_1 = arith.constant 0 : index
    %c0_2 = arith.constant 0 : index
    %1 = vector.load %arg1[%c0_1, %c0_2] : memref<6x128xbf16, #tpu.memory_space<vmem>>, vector<6x128xbf16>
    %cst = arith.constant dense<0.000000e+00> : vector<48x128xf32>
    %2 = tpu.matmul %0, %1, %cst {dimension_numbers = #tpu.dot_dimension_numbers<[1], [0], [0], [1], [0, 0, 1, 1], [], []>} : vector<48x6xbf16>, vector<6x128xbf16>, vector<48x128xf32> -> vector<48x128xf32>
    %3 = vector.extract_strided_slice %2 {offsets = [0, 0], sizes = [16, 128], strides = [1, 1]} : vector<48x128xf32> to vector<16x128xf32>
    %4 = math.tanh %3 : vector<16x128xf32>
    %5 = vector.extract_strided_slice %2 {offsets = [16, 0], sizes = [16, 128], strides = [1, 1]} : vector<48x128xf32> to vector<16x128xf32>
    %6 = math.tanh %5 : vector<16x128xf32>
    %7 = vector.extract_strided_slice %2 {offsets = [32, 0], sizes = [16, 128], strides = [1, 1]} : vector<48x128xf32> to vector<16x128xf32>
    %c0_3 = arith.constant 0 : index
    %c0_4 = arith.constant 0 : index
    %8 = vector.load %arg3[%c0_3, %c0_4] : memref<16x1xf32, #tpu.memory_space<vmem>>, vector<16x1xf32>
    %9 = vector.broadcast %8 : vector<16x1xf32> to vector<16x128xf32>
    %10 = arith.mulf %4, %9 : vector<16x128xf32>
    %11 = arith.addf %7, %10 : vector<16x128xf32>
    %12 = math.tanh %11 : vector<16x128xf32>
    %cst_5 = arith.constant 1.000000e+00 : f32
    %13 = vector.broadcast %cst_5 : f32 to vector<16x128xf32>
    %14 = arith.subf %13, %6 : vector<16x128xf32>
    %15 = arith.mulf %14, %12 : vector<16x128xf32>
    %c0_6 = arith.constant 0 : index
    %c0_7 = arith.constant 0 : index
    %16 = vector.load %arg4[%c0_6, %c0_7] : memref<16x1xf32, #tpu.memory_space<vmem>>, vector<16x1xf32>
    %17 = vector.broadcast %16 : vector<16x1xf32> to vector<16x128xf32>
    %18 = arith.mulf %15, %17 : vector<16x128xf32>
    %cst_8 = arith.constant dense<0.000000e+00> : vector<128xf32>
    %19 = vector.multi_reduction <add>, %18, %cst_8 [0] : vector<16x128xf32> to vector<128xf32>
    %20 = vector.shape_cast %19 : vector<128xf32> to vector<1x128xf32>
    %c0_9 = arith.constant 0 : index
    %c0_10 = arith.constant 0 : index
    %21 = vector.load %arg5[%c0_9, %c0_10] : memref<1x1xf32, #tpu.memory_space<vmem>>, vector<1x1xf32>
    %22 = vector.broadcast %21 : vector<1x1xf32> to vector<1x128xf32>
    %23 = arith.addf %20, %22 : vector<1x128xf32>
    %c0_11 = arith.constant 0 : index
    %c0_12 = arith.constant 0 : index
    %24 = vector.load %arg6[%c0_11, %c0_12] : memref<1x128xf32, #tpu.memory_space<vmem>>, vector<1x128xf32>
    tpu.vector_store %arg6[%c0_11, %c0_12], %23 {strides = array<i32>} : memref<1x128xf32, #tpu.memory_space<vmem>>, vector<1x128xf32>,
    return
  }
  func.func @transform_0(%arg0: i32) -> (i32, i32) {
    %c0_i32 = arith.constant 0 : i32
    %c0_i32_0 = arith.constant 0 : i32
    return %c0_i32, %arg0 : i32, i32
  }
  func.func @transform_1(%arg0: i32) -> (i32, i32) {
    %c0_i32 = arith.constant 0 : i32
    %c0_i32_0 = arith.constant 0 : i32
    %c0_i32_1 = arith.constant 0 : i32
    return %c0_i32, %c0_i32_0 : i32, i32
  }
  func.func @transform_2(%arg0: i32) -> (i32, i32) {
    %c0_i32 = arith.constant 0 : i32
    %c0_i32_0 = arith.constant 0 : i32
    %c0_i32_1 = arith.constant 0 : i32
    return %c0_i32, %c0_i32_0 : i32, i32
  }
  func.func @transform_3(%arg0: i32) -> (i32, i32) {
    %c0_i32 = arith.constant 0 : i32
    %c0_i32_0 = arith.constant 0 : i32
    %c0_i32_1 = arith.constant 0 : i32
    return %c0_i32, %c0_i32_0 : i32, i32
  }
  func.func @transform_4(%arg0: i32) -> (i32, i32) {
    %c0_i32 = arith.constant 0 : i32
    %c0_i32_0 = arith.constant 0 : i32
    %c0_i32_1 = arith.constant 0 : i32
    return %c0_i32, %c0_i32_0 : i32, i32
  }
  func.func @transform_5(%arg0: i32) -> (i32, i32) {
    %c0_i32 = arith.constant 0 : i32
    %c0_i32_0 = arith.constant 0 : i32
    return %c0_i32, %arg0 : i32, i32
  }
}

</mosaic_0001>

<bundles_post_ra>
// kernel: tpu_custom_call.1
= control target key start
LH: loop header
LB: loop body
LE: loop exit
PB: predicated region body
PF: predicated region fallthrough
CT: control target
= control target key end

     0   :  { %s337_s0 = inlined_call_operand.vmem [shape: bf16[6,128], index: 0, kind: input, shape index: {}]   ;;  %s338_s1 = inlined_call_operand.vmem [shape: bf16[48,6], index: 1, kind: input, shape index: {}]   ;;  %s339_s2 = inlined_call_operand.vmem [shape: f32[16,1], index: 2, kind: input, shape index: {}]   ;;  %s340_s3 = inlined_call_operand.vmem [shape: f32[16,1], index: 3, kind: input, shape index: {}]   ;;  %s341_s4 = inlined_call_operand.<no memory space> [shape: f32[1,1], index: 4, kind: input, shape index: {}]   ;;  %s342_s5 = inlined_call_operand.hbm [shape: f32[1,128], index: 5, kind: output, shape index: {}]  }
   0x1   :  { %v10_v0 = vstv %s341_s4 }
   0x2   :  { %11 = vst [vmem:[#allocation2] sm:$0x1] %v10_v0 }
   0x3   :  { %v30_v1 = vld [vmem:[%s337_s0] sm:$0x7]  ;;  %vm56_vm0 = vcmask 1042432   ;;  %v261_v3 = vmov 0.0   ;;  %vm46_vm1 = vcmask 48128   ;;  %v223_v5 = vld [vmem:[%s338_s1 + $0x8] sm:$0xff]  }
   0x4   :  { %v222_v2 = vld [vmem:[%s338_s1] sm:$0xff]   ;;  %200 = vmatprep.subr.bf16.mxu0 %v261_v3  ;;  %v58_v4 = vsel %vm56_vm0, %v30_v1, 0  ;;  %214 = vmatprep.subr.bf16.mxu1 %v261_v3  ;;  %vm262_vm2 = vmmov 0   ;;  %v263_v6 = vmov 0  }
   0x5   :  { %201 = vmatpush3.bf16.msra.mxu0 %v58_v4  ;;  %215 = vmatpush3.bf16.msra.mxu1 %v58_v4  ;;  %v121_v7 = vld [vmem:[%s339_s2] sm:$0xff] }
   0x6   :  { %202 = vmatprep.mubr.msk.bf16.mxu0 %vm262_vm2, %v261_v3  ;;  %206 = vmatprep.mubr.msk.bf16.mxu1 %vm262_vm2, %v261_v3  ;;  %v143_v8 = vld [vmem:[%s340_s3] sm:$0xff] }
   0x7   :  { %220 = vset.pattern.permute.xlu0 %v263_v6  ;;  %221 = vset.pattern.permute.xlu1 %v263_v6 }
   0x8   :  { %203 = vmatmul.mubr.msk.bf16.vlgmr.msra.gmra.mrb[0].mxu0 %vm46_vm1, %v222_v2  ;;  %207 = vmatmul.mubr.msk.bf16.vlgmr.msra.gmra.mrb[0].mxu1 %vm46_vm1, %v223_v5 }
   0x9   :  { %12 = vsyncpa [#allocation4], 0  ;;  %210 = vmatprep.mubr.msk.bf16.mxu1 %vm262_vm2, %v261_v3  ;;  %125 = vperm.xlu0 %220, %v121_v7   ;;  %v122_v9 = vld [vmem:[%s339_s2 + $0x8] sm:$0xff]  ;;  %v224_v11 = vld [vmem:[%s338_s1 + $0x10] sm:$0xff]   ;;  %v170_v45 = vlaneseq  ;;  %s264_s1 = smov [#allocation3]  }
   0xa   :  { %147 = vperm.xlu1 %221, %v143_v8   ;;  %v144_v10 = vld [vmem:[%s340_s3 + $0x8] sm:$0xff]  ;;  %v164_v12 = vld [vmem:[#allocation2] sm:$0x1]  ;;  %s182_s2 = sshll.u32 %s264_s1, 4  ;;  %s183_s2 = int_to_ptr.vmem [resolvable:$true] %s182_s2 }
   0xb   :  { %v171_v48 = vshrl.u32 %v170_v45, 7  ;;  %s237_s3 = scalar_lea.vmem %s183_s2, 16  ;;  %s241_s9 = scalar_lea.vmem %s183_s2, 32 }
   0xc   :  { %p238_p0 = scmp.ne.s32.totalorder %s183_s2, %s237_s3  ;;  %p242_p1 = scmp.lt.s32.totalorder %s183_s2, %s183_s2 }
   0xd   :  { %130 = vperm.xlu0 %220, %v122_v9   ;;  %v172_v51 = vsub.s32 0, %v171_v48  ;;  %p243_p2 = scmp.lt.s32.totalorder %s241_s9, %s237_s3 }
   0xe   :  { %152 = vperm.xlu1 %221, %v144_v10  }
   0xf   :  { %p244_p3 = por %p243_p2, %p242_p1 }
  0x10   :  { %211 = vmatmul.mubr.msk.bf16.gmra.mrb[4].mxu1 %vm46_vm1, %v224_v11 }
  0x11   :  { %167 = vperm.xlu0 %220, %v164_v12   ;;  %p245_p4 = pnand %p244_p3, %p238_p0 }
  0x88   :  { %v126_v21 = vpop.permute.xlu0 %125 }
  0x89   :  { %v148_v35 = vpop.permute.xlu1 %147 }
  0x8c   :  { %v131_v29 = vpop.permute.xlu0 %130 }
  0x8d   :  { %v153_v42 = vpop.permute.xlu1 %152 }
  0x90   :  { %v168_v53 = vpop.permute.xlu0 %167 }
  0x91   :  { %v173_v55 = vrot.slane %v168_v53, %v172_v51 }
  0xdb   :  { %v94_v13 = vpop.f32.mrb[0].mxu0  ;;  %v102_v14 = vpop.f32.mrb[0].mxu1 }
  0xdc   :  { %225 = vtanh.f32 %v94_v13  ;;  %v204_v15 = vpop.f32.mrb[1].mxu0  ;;  %v208_v16 = vpop.f32.mrb[1].mxu1 }
  0xdd   :  { %v97_v17 = vpop.f32.mrb[2].mxu0  ;;  %v105_v18 = vpop.f32.mrb[2].mxu1 }
  0xde   :  { %227 = vtanh.f32 %v97_v17  ;;  %v205_v19 = vpop.f32.mrb[3].mxu0  ;;  %v209_v20 = vpop.f32.mrb[3].mxu1 }
  0xdf   :  { %229 = vtanh.f32 %v102_v14 }
  0xe0   :  { %231 = vtanh.f32 %v105_v18 }
  0xe3   :  { %v110_v22 = vpop.f32.mrb[4].mxu1 }
  0xe4   :  { %v212_v23 = vpop.f32.mrb[5].mxu1 }
  0xe5   :  { %v113_v24 = vpop.f32.mrb[6].mxu1 }
  0xe6   :  { %v226_v25 = vpop.eup %225  ;;  %v213_v26 = vpop.f32.mrb[7].mxu1 }
  0xe7   :  { %v133_v27 = vmul.f32 %v226_v25, %v126_v21 }
  0xe8   :  { %v228_v28 = vpop.eup %227 }
  0xe9   :  { %v134_v30 = vmul.f32 %v228_v28, %v131_v29  ;;  %v135_v31 = vadd.f32 %v133_v27, %v110_v22  ;;  %v230_v33 = vpop.eup %229 }
  0xea   :  { %v232_v34 = vpop.eup %231  ;;  %v139_v36 = vsub.f32 1.0, %v230_v33 }
  0xeb   :  { %233 = vtanh.f32 %v135_v31  ;;  %v136_v32 = vadd.f32 %v134_v30, %v113_v24  ;;  %v140_v38 = vsub.f32 1.0, %v232_v34 }
  0xed   :  { %235 = vtanh.f32 %v136_v32 }
  0xf5   :  { %v234_v37 = vpop.eup %233 }
  0xf6   :  { %v141_v39 = vmul.f32 %v234_v37, %v139_v36 }
  0xf7   :  { %v236_v40 = vpop.eup %235 }
  0xf8   :  { %v142_v41 = vmul.f32 %v236_v40, %v140_v38  ;;  %v155_v43 = vmul.f32 %v148_v35, %v141_v39 }
  0xfa   :  { %v156_v44 = vmul.f32 %v153_v42, %v142_v41 }
  0xfc   :  { %v157_v46 = vadd.f32 %v156_v44, %v155_v43 }
  0xfe   :  { %v158_v47 = vrot.slane %v157_v46, 4 }
 0x100   :  { %v159_v49 = vadd.f32 %v158_v47, %v157_v46 }
 0x102   :  { %v160_v50 = vrot.slane %v159_v49, 2 }
 0x104   :  { %v161_v52 = vadd.f32 %v160_v50, %v159_v49 }
 0x106   :  { %v162_v54 = vrot.slane %v161_v52, 1 }
 0x108   :  { %v163_v56 = vadd.f32 %v162_v54, %v161_v52 }
 0x10a   :  { %v174_v57 = vadd.f32 %v173_v55, %v163_v56 }
 0x10c   :  { %175 = vst [vmem:[#allocation3] sm:$0x1] %v174_v57 }
 0x10d   :  { %248 = shalt.err (!%p245_p4)
}
 0x10e   :  { %s249_s12 = scalar_lea.hbm %s342_s5, 16 }
 0x10f   :  { %p250_p5 = scmp.ne.s32.totalorder %s342_s5, %s249_s12  ;;  %p253_p6 = scmp.lt.u32.totalorder %s249_s12, %s342_s5 }
 0x111   :  { %p255_p7 = pnand %p253_p6, %p250_p5 }
 0x113   :  { %258 = shalt.err (!%p255_p7)
}
 0x114   :  { %185 = dma.vmem_to_hbm [thread:$0]  %s183_s2, 16, %s342_s5, [#allocation4]  }
 0x115   :  { %259 = dma.done.wait [#allocation4], 16  }
 0x116   :  { %260 = vsyncadd [#allocation4], 4294967280 }
 0x117   :  { %189 = vsyncpa [#allocation4], 1 }

</bundles_post_ra>
